<compile_context>
chip_gen: v6e
topology: v6e:2x2x1
jax: 0.10.0
libtpu: 0.0.40
codegen_flags: <defaults>
</compile_context>

<pallas_src>
import math

import jax
import jax.numpy as jnp
from jax import lax
from jax.experimental import pallas as pl
from jax.experimental.pallas import tpu as pltpu

MODEL_DIM = 32
FF_DIM = 2048
BATCH = 2
SEQ = 8

F_CHUNK = 512
N_CHUNKS = FF_DIM // F_CHUNK


def feedforward_kernel(x_ref, w1_ref, b1_ref, w2_ref, b2_ref, o_ref):
    # x_ref:  (N, D) f32        w1_ref: (D, F) bf16    b1_ref: (1, F) f32
    # w2_ref: (D, F) bf16 (torch-native out x in, lane-dense)
    # b2_ref: (1, D) f32        o_ref:  (N, D) f32
    n = x_ref.shape[0]
    d = o_ref.shape[1]

    x = x_ref[...].astype(jnp.bfloat16)          # (N, D) -> MXU input dtype
    acc = jnp.zeros((n, d), jnp.float32)         # (N, D) f32 accumulator

    # Chunk the FF dimension: per 512-wide slice compute
    #   relu(x @ w1[:, c] + b1[c])  (f32 accumulation)
    # and accumulate its contribution to linear2 via h @ w2[:, c].T.
    # Static unroll (4 iterations); only `x` and `acc` live across chunks.
    for c in range(N_CHUNKS):
        lo = c * F_CHUNK
        hi = lo + F_CHUNK
        w1c = w1_ref[:, lo:hi]                   # (D, Fc) bf16
        b1c = b1_ref[:, lo:hi]                   # (1, Fc) f32
        h = jnp.dot(x, w1c, preferred_element_type=jnp.float32) + b1c
        h = jnp.maximum(h, 0.0)                  # ReLU; dropout == identity
        w2c = w2_ref[:, lo:hi]                   # (D, Fc) bf16
        # h (N, Fc) . w2c (D, Fc) contracted on last dims == h @ w2c.T
        acc = acc + lax.dot_general(
            h.astype(jnp.bfloat16), w2c,
            dimension_numbers=(((1,), (1,)), ((), ())),
            preferred_element_type=jnp.float32)

    o_ref[...] = (acc + b2_ref[...]).astype(o_ref.dtype)


def prepare_params(params):
    """One-time parameter prep: bf16 weight copies (halves weight HBM traffic).

    Call once after building/loading parameters, NOT per forward call - this
    hoists the f32->bf16 cast out of the per-call path.
    """
    return {
        "w1": params["w1"].astype(jnp.bfloat16),   # (D, F)  lane-dense
        "b1": params["b1"],                        # (1, F)  f32
        "w2": params["w2"].astype(jnp.bfloat16),   # (D, F)  torch-native, lane-dense
        "b2": params["b2"],                        # (1, D)  f32
    }


def feed_forward(x, prepped):
    """x: (B, S, D) float32 -> (B, S, D) float32. `prepped` from prepare_params()."""
    B, S, D = x.shape
    N = B * S
    x2 = x.reshape(N, D)   # fuse batch & sequence: one grid-less kernel call

    vmem = pl.BlockSpec(memory_space=pltpu.MemorySpace.VMEM)
    out2 = pl.pallas_call(
        feedforward_kernel,
        out_shape=jax.ShapeDtypeStruct((N, D), jnp.float32),
        in_specs=[vmem, vmem, vmem, vmem, vmem],
        out_specs=vmem,
    )(x2, prepped["w1"], prepped["b1"], prepped["w2"], prepped["b2"])
    return out2.reshape(B, S, D)


def make_params(key):
    k1, k2, k3, k4 = jax.random.split(key, 4)
    s1 = 1.0 / math.sqrt(MODEL_DIM)   # nn.Linear(model_dim, ff_dim) init bound
    s2 = 1.0 / math.sqrt(FF_DIM)      # nn.Linear(ff_dim, model_dim) init bound
    return {
        # w1 stored (in=D, out=F) so linear1 is x @ w1 (lane-dense).
        "w1": jax.random.uniform(k1, (MODEL_DIM, FF_DIM), jnp.float32, -s1, s1),
        "b1": jax.random.uniform(k2, (1, FF_DIM), jnp.float32, -s1, s1),
        # w2 stored torch-native (out=D, in=F); linear2 is h @ w2.T (lane-dense).
        "w2": jax.random.uniform(k3, (MODEL_DIM, FF_DIM), jnp.float32, -s2, s2),
        "b2": jax.random.uniform(k4, (1, MODEL_DIM), jnp.float32, -s2, s2),
    }


def ref_forward(x, params):
    """Plain-JAX f32 reference (dropout = identity)."""
    h = jnp.maximum(x @ params["w1"] + params["b1"], 0.0)
    return h @ params["w2"].T + params["b2"]


# TODO(synk): training-mode dropout is not implemented (inference/identity
# semantics only); it would require pltpu.prng_seed / prng_random_bits.

if __name__ == "__main__":
    key = jax.random.PRNGKey(0)
    kp, kx = jax.random.split(key)
    params = make_params(kp)
    prepped = prepare_params(params)     # one-time bf16 weight prep (hoisted cast)
    x = jax.random.normal(kx, (BATCH, SEQ, MODEL_DIM), jnp.float32)

    out = feed_forward(x, prepped)
    out = jax.block_until_ready(out)

    ref = ref_forward(x, params)
    assert out.shape == (BATCH, SEQ, MODEL_DIM)
    # tolerance loosened because weights/activations enter the MXU as bf16
    # (accumulation is f32)
    max_err = float(jnp.max(jnp.abs(out - ref)))
    assert jnp.allclose(out, ref, rtol=2e-2, atol=2e-2), (
        f"max abs diff {max_err}")

    print("KERNEL_OK")
</pallas_src>

<mosaic_0001>
module attributes {stable_mosaic.version = 11 : i64} {
  func.func @feedforward_kernel(%arg0: memref<16x32xf32, #tpu.memory_space<vmem>>, %arg1: memref<32x2048xbf16, #tpu.memory_space<vmem>>, %arg2: memref<1x2048xf32, #tpu.memory_space<vmem>>, %arg3: memref<32x2048xbf16, #tpu.memory_space<vmem>>, %arg4: memref<1x32xf32, #tpu.memory_space<vmem>>, %arg5: memref<16x32xf32, #tpu.memory_space<vmem>>) attributes {dimension_semantics = [], scalar_prefetch = 0 : i64, scratch_operands = 0 : i64, tpu.core_type = #tpu.core_type<tc>} {
    %c0 = arith.constant 0 : index
    %c0_0 = arith.constant 0 : index
    %0 = vector.load %arg0[%c0, %c0_0] : memref<16x32xf32, #tpu.memory_space<vmem>>, vector<16x32xf32>
    %1 = arith.truncf %0 : vector<16x32xf32> to vector<16x32xbf16>
    %cst = arith.constant 0.000000e+00 : f32
    %2 = vector.broadcast %cst : f32 to vector<16x32xf32>
    %c0_1 = arith.constant 0 : index
    %c0_2 = arith.constant 0 : index
    %3 = vector.load %arg1[%c0_1, %c0_2] : memref<32x2048xbf16, #tpu.memory_space<vmem>>, vector<32x512xbf16>
    %c0_3 = arith.constant 0 : index
    %c0_4 = arith.constant 0 : index
    %4 = vector.load %arg2[%c0_3, %c0_4] : memref<1x2048xf32, #tpu.memory_space<vmem>>, vector<1x512xf32>
    %cst_5 = arith.constant dense<0.000000e+00> : vector<16x512xf32>
    %5 = tpu.matmul %1, %3, %cst_5 {dimension_numbers = #tpu.dot_dimension_numbers<[1], [0], [0], [1], [0, 0, 1, 1], [], []>} : vector<16x32xbf16>, vector<32x512xbf16>, vector<16x512xf32> -> vector<16x512xf32>
    %6 = vector.broadcast %4 : vector<1x512xf32> to vector<16x512xf32>
    %7 = arith.addf %5, %6 : vector<16x512xf32>
    %cst_6 = arith.constant 0.000000e+00 : f32
    %8 = vector.broadcast %cst_6 : f32 to vector<16x512xf32>
    %9 = arith.maximumf %7, %8 : vector<16x512xf32>
    %c0_7 = arith.constant 0 : index
    %c0_8 = arith.constant 0 : index
    %10 = vector.load %arg3[%c0_7, %c0_8] : memref<32x2048xbf16, #tpu.memory_space<vmem>>, vector<32x512xbf16>
    %11 = arith.truncf %9 : vector<16x512xf32> to vector<16x512xbf16>
    %cst_9 = arith.constant dense<0.000000e+00> : vector<16x32xf32>
    %12 = tpu.matmul %11, %10, %cst_9 {dimension_numbers = #tpu.dot_dimension_numbers<[1], [1], [0], [0], [0, 0, 1, 0], [], []>} : vector<16x512xbf16>, vector<32x512xbf16>, vector<16x32xf32> -> vector<16x32xf32>
    %13 = arith.addf %2, %12 : vector<16x32xf32>
    %c0_10 = arith.constant 0 : index
    %c512 = arith.constant 512 : index
    %14 = vector.load %arg1[%c0_10, %c512] : memref<32x2048xbf16, #tpu.memory_space<vmem>>, vector<32x512xbf16>
    %c0_11 = arith.constant 0 : index
    %c512_12 = arith.constant 512 : index
    %15 = vector.load %arg2[%c0_11, %c512_12] : memref<1x2048xf32, #tpu.memory_space<vmem>>, vector<1x512xf32>
    %cst_13 = arith.constant dense<0.000000e+00> : vector<16x512xf32>
    %16 = tpu.matmul %1, %14, %cst_13 {dimension_numbers = #tpu.dot_dimension_numbers<[1], [0], [0], [1], [0, 0, 1, 1], [], []>} : vector<16x32xbf16>, vector<32x512xbf16>, vector<16x512xf32> -> vector<16x512xf32>
    %17 = vector.broadcast %15 : vector<1x512xf32> to vector<16x512xf32>
    %18 = arith.addf %16, %17 : vector<16x512xf32>
    %cst_14 = arith.constant 0.000000e+00 : f32
    %19 = vector.broadcast %cst_14 : f32 to vector<16x512xf32>
    %20 = arith.maximumf %18, %19 : vector<16x512xf32>
    %c0_15 = arith.constant 0 : index
    %c512_16 = arith.constant 512 : index
    %21 = vector.load %arg3[%c0_15, %c512_16] : memref<32x2048xbf16, #tpu.memory_space<vmem>>, vector<32x512xbf16>
    %22 = arith.truncf %20 : vector<16x512xf32> to vector<16x512xbf16>
    %cst_17 = arith.constant dense<0.000000e+00> : vector<16x32xf32>
    %23 = tpu.matmul %22, %21, %cst_17 {dimension_numbers = #tpu.dot_dimension_numbers<[1], [1], [0], [0], [0, 0, 1, 0], [], []>} : vector<16x512xbf16>, vector<32x512xbf16>, vector<16x32xf32> -> vector<16x32xf32>
    %24 = arith.addf %13, %23 : vector<16x32xf32>
    %c0_18 = arith.constant 0 : index
    %c1024 = arith.constant 1024 : index
    %25 = vector.load %arg1[%c0_18, %c1024] : memref<32x2048xbf16, #tpu.memory_space<vmem>>, vector<32x512xbf16>
    %c0_19 = arith.constant 0 : index
    %c1024_20 = arith.constant 1024 : index
    %26 = vector.load %arg2[%c0_19, %c1024_20] : memref<1x2048xf32, #tpu.memory_space<vmem>>, vector<1x512xf32>
    %cst_21 = arith.constant dense<0.000000e+00> : vector<16x512xf32>
    %27 = tpu.matmul %1, %25, %cst_21 {dimension_numbers = #tpu.dot_dimension_numbers<[1], [0], [0], [1], [0, 0, 1, 1], [], []>} : vector<16x32xbf16>, vector<32x512xbf16>, vector<16x512xf32> -> vector<16x512xf32>
    %28 = vector.broadcast %26 : vector<1x512xf32> to vector<16x512xf32>
    %29 = arith.addf %27, %28 : vector<16x512xf32>
    %cst_22 = arith.constant 0.000000e+00 : f32
    %30 = vector.broadcast %cst_22 : f32 to vector<16x512xf32>
    %31 = arith.maximumf %29, %30 : vector<16x512xf32>
    %c0_23 = arith.constant 0 : index
    %c1024_24 = arith.constant 1024 : index
    %32 = vector.load %arg3[%c0_23, %c1024_24] : memref<32x2048xbf16, #tpu.memory_space<vmem>>, vector<32x512xbf16>
    %33 = arith.truncf %31 : vector<16x512xf32> to vector<16x512xbf16>
    %cst_25 = arith.constant dense<0.000000e+00> : vector<16x32xf32>
    %34 = tpu.matmul %33, %32, %cst_25 {dimension_numbers = #tpu.dot_dimension_numbers<[1], [1], [0], [0], [0, 0, 1, 0], [], []>} : vector<16x512xbf16>, vector<32x512xbf16>, vector<16x32xf32> -> vector<16x32xf32>
    %35 = arith.addf %24, %34 : vector<16x32xf32>
    %c0_26 = arith.constant 0 : index
    %c1536 = arith.constant 1536 : index
    %36 = vector.load %arg1[%c0_26, %c1536] : memref<32x2048xbf16, #tpu.memory_space<vmem>>, vector<32x512xbf16>
    %c0_27 = arith.constant 0 : index
    %c1536_28 = arith.constant 1536 : index
    %37 = vector.load %arg2[%c0_27, %c1536_28] : memref<1x2048xf32, #tpu.memory_space<vmem>>, vector<1x512xf32>
    %cst_29 = arith.constant dense<0.000000e+00> : vector<16x512xf32>
    %38 = tpu.matmul %1, %36, %cst_29 {dimension_numbers = #tpu.dot_dimension_numbers<[1], [0], [0], [1], [0, 0, 1, 1], [], []>} : vector<16x32xbf16>, vector<32x512xbf16>, vector<16x512xf32> -> vector<16x512xf32>
    %39 = vector.broadcast %37 : vector<1x512xf32> to vector<16x512xf32>
    %40 = arith.addf %38, %39 : vector<16x512xf32>
    %cst_30 = arith.constant 0.000000e+00 : f32
    %41 = vector.broadcast %cst_30 : f32 to vector<16x512xf32>
    %42 = arith.maximumf %40, %41 : vector<16x512xf32>
    %c0_31 = arith.constant 0 : index
    %c1536_32 = arith.constant 1536 : index
    %43 = vector.load %arg3[%c0_31, %c1536_32] : memref<32x2048xbf16, #tpu.memory_space<vmem>>, vector<32x512xbf16>
    %44 = arith.truncf %42 : vector<16x512xf32> to vector<16x512xbf16>
    %cst_33 = arith.constant dense<0.000000e+00> : vector<16x32xf32>
    %45 = tpu.matmul %44, %43, %cst_33 {dimension_numbers = #tpu.dot_dimension_numbers<[1], [1], [0], [0], [0, 0, 1, 0], [], []>} : vector<16x512xbf16>, vector<32x512xbf16>, vector<16x32xf32> -> vector<16x32xf32>
    %46 = arith.addf %35, %45 : vector<16x32xf32>
    %c0_34 = arith.constant 0 : index
    %c0_35 = arith.constant 0 : index
    %47 = vector.load %arg4[%c0_34, %c0_35] : memref<1x32xf32, #tpu.memory_space<vmem>>, vector<1x32xf32>
    %48 = vector.broadcast %47 : vector<1x32xf32> to vector<16x32xf32>
    %49 = arith.addf %46, %48 : vector<16x32xf32>
    %c0_36 = arith.constant 0 : index
    %c0_37 = arith.constant 0 : index
    %50 = vector.load %arg5[%c0_36, %c0_37] : memref<16x32xf32, #tpu.memory_space<vmem>>, vector<16x32xf32>
    tpu.vector_store %arg5[%c0_36, %c0_37], %49 {strides = array<i32>} : memref<16x32xf32, #tpu.memory_space<vmem>>, vector<16x32xf32>,
    return
  }
}

</mosaic_0001>

<bundles_post_ra>
// kernel: tpu_custom_call.1
= control target key start
LH: loop header
LB: loop body
LE: loop exit
PB: predicated region body
PF: predicated region fallthrough
CT: control target
= control target key end

     0   :  { %10 = vsyncpa [#allocation3], 0  ;;  %s1683_s0 = inlined_call_operand.hbm [shape: f32[16,32], index: 0, kind: input, shape index: {}]   ;;  %s1684_s1 = inlined_call_operand.hbm [shape: bf16[32,2048], index: 1, kind: input, shape index: {}]   ;;  %s1685_s2 = inlined_call_operand.hbm [shape: f32[1,2048], index: 2, kind: input, shape index: {}]   ;;  %s1686_s3 = inlined_call_operand.hbm [shape: bf16[32,2048], index: 3, kind: input, shape index: {}]   ;;  %s1687_s4 = inlined_call_operand.vmem [shape: f32[1,32], index: 4, kind: input, shape index: {}]   ;;  %s1688_s5 = inlined_call_operand.hbm [shape: f32[16,32], index: 5, kind: output, shape index: {}]  }
   0x1   :  { %11 = vsyncpa [#allocation6], 0 }
   0x2   :  { %12 = vsyncpa [#allocation9], 0 }
   0x3   :  { %13 = vsyncpa [#allocation4], 0  ;;  %s1499_s18 = smov [#allocation5]  }
   0x4   :  { %s31_s19 = sshll.u32 %s1499_s18, 4  ;;  %s32_s19 = int_to_ptr.vmem [resolvable:$true] %s31_s19 }
   0x5   :  { %s1399_s20 = scalar_lea.vmem %s32_s19, 4096  ;;  %p1404_p1 = scmp.lt.s32.totalorder %s32_s19, %s32_s19 }
   0x6   :  { %p1400_p0 = scmp.ne.s32.totalorder %s32_s19, %s1399_s20  ;;  %p1405_p2 = scmp.lt.s32.totalorder %s1399_s20, %s1399_s20 }
   0x8   :  { %p1406_p3 = por %p1405_p2, %p1404_p1 }
   0xa   :  { %p1407_p4 = pnand %p1406_p3, %p1400_p0 }
   0xc   :  { %1410 = shalt.err (!%p1407_p4)
}
   0xd   :  { %s1500_s21 = smov 1024   ;;  %s1501_s22 = smov 64  }
   0xe   :  { %37 = dma.hbm_to_vmem [thread:$0]  %s1684_s1, 4096, %s32_s19, [#allocation6], %s1500_s21, %s1500_s21, %s1501_s22  }
   0xf   :  { %s1502_s25 = smov [#allocation2]  }
  0x10   :  { %s19_s26 = sshll.u32 %s1502_s25, 4  ;;  %s20_s26 = int_to_ptr.vmem [resolvable:$true] %s19_s26 }
  0x11   :  { %s1419_s27 = scalar_lea.vmem %s20_s26, 256  ;;  %p1424_p6 = scmp.lt.s32.totalorder %s20_s26, %s20_s26 }
  0x12   :  { %p1420_p5 = scmp.ne.s32.totalorder %s20_s26, %s1419_s27  ;;  %p1425_p7 = scmp.lt.s32.totalorder %s1419_s27, %s1419_s27 }
  0x14   :  { %p1426_p8 = por %p1425_p7, %p1424_p6 }
  0x16   :  { %p1427_p9 = pnand %p1426_p8, %p1420_p5 }
  0x18   :  { %1430 = shalt.err (!%p1427_p9)
}
  0x19   :  { %s1503_s28 = smov 128   ;;  %s1504_s29 = smov 8  }
  0x1a   :  { %25 = dma.hbm_to_vmem [thread:$0]  %s1683_s0, 256, %s20_s26, [#allocation3], %s1503_s28, %s1503_s28, %s1504_s29  }
  0x1b   :  { %s1505_s1 = smov [#allocation7]   ;;  %s1506_s8 = smov [#allocation8]  }
  0x1c   :  { %s44_s7 = sshll.u32 %s1505_s1, 4  ;;  %s53_s9 = sshll.u32 %s1506_s8, 4  ;;  %s45_s7 = int_to_ptr.vmem [resolvable:$true] %s44_s7  ;;  %s54_s9 = int_to_ptr.vmem [resolvable:$true] %s53_s9 }
  0x1d   :  { %s1439_s10 = scalar_lea.vmem %s45_s7, 256  ;;  %p1444_p11 = scmp.lt.s32.totalorder %s45_s7, %s45_s7 }
  0x1e   :  { %p1440_p10 = scmp.ne.s32.totalorder %s45_s7, %s1439_s10  ;;  %p1445_p12 = scmp.lt.s32.totalorder %s1439_s10, %s1439_s10 }
  0x20   :  { %p1446_p13 = por %p1445_p12, %p1444_p11 }
  0x22   :  { %p1447_p0 = pnand %p1446_p13, %p1440_p10 }
  0x24   :  { %1450 = shalt.err (!%p1447_p0)
}
  0x25   :  { %47 = dma.hbm_to_vmem [thread:$0]  %s1685_s2, 256, %s45_s7, [#allocation6]  }
  0x26   :  { %s1459_s13 = scalar_lea.vmem %s54_s9, 4096  ;;  %p1464_p2 = scmp.lt.s32.totalorder %s54_s9, %s54_s9 }
  0x27   :  { %p1460_p1 = scmp.ne.s32.totalorder %s54_s9, %s1459_s13  ;;  %p1465_p3 = scmp.lt.s32.totalorder %s1459_s13, %s1459_s13 }
  0x29   :  { %p1466_p4 = por %p1465_p3, %p1464_p2 }
  0x2b   :  { %p1467_p5 = pnand %p1466_p4, %p1460_p1 }
  0x2d   :  { %1470 = shalt.err (!%p1467_p5)
}
  0x2e   :  { %59 = dma.hbm_to_vmem [thread:$0]  %s1686_s3, 4096, %s54_s9, [#allocation9], %s1500_s21, %s1500_s21, %s1501_s22  }
  0x2f   :  { %1491 = dma.done.wait [#allocation3], 256  }
  0x30   :  { %1492 = vsyncadd [#allocation3], 4294967040 }
  0x31   :  { %1493 = dma.done.wait [#allocation6], 4352  }
  0x32   :  { %1494 = vsyncadd [#allocation6], 4294962944 }
  0x33   :  { %1495 = dma.done.wait [#allocation9], 4096  }
  0x34   :  { %1496 = vsyncadd [#allocation9], 4294963200  ;;  %v1507_v0 = vmov 0   ;;  %v82_v1 = vld [vmem:[#allocation5 + $0x80] sm:$0xff]  ;;  %v83_v3 = vld [vmem:[#allocation5 + $0x88] sm:$0xff]  ;;  %vm148_vm0 = vcmask 261120   ;;  %v88_v60 = vlaneseq }
  0x35   :  { %184 = vmatprep.mubr.bf16.mxu0 %v1507_v0  ;;  %227 = vmatprep.mubr.bf16.mxu1 %v1507_v0  ;;  %v84_v2 = vld [vmem:[#allocation5 + $0xc0] sm:$0xff]  ;;  %v85_v5 = vld [vmem:[#allocation5 + $0xc8] sm:$0xff]  ;;  %v75_v15 = vld [vmem:[#allocation2] sm:$0xff]  ;;  %s1508_s15 = smov [#allocation10]  }
  0x36   :  { %v1313_v4 = vcombine.high %v82_v1, %v84_v2  ;;  %v1312_v6 = vcombine.low %v82_v1, %v84_v2  ;;  %v78_v7 = vld [vmem:[#allocation5] sm:$0xff]  ;;  %v1315_v9 = vcombine.high %v83_v3, %v85_v5  ;;  %v1314_v10 = vcombine.low %v83_v3, %v85_v5  ;;  %v79_v12 = vld [vmem:[#allocation5 + $0x8] sm:$0xff]  ;;  %v262_v16 = vld [vmem:[#allocation5 + $0x90] sm:$0xff]  ;;  %s1294_s16 = sshll.u32 %s1508_s15, 4  ;;  %s1295_s16 = int_to_ptr.vmem [resolvable:$true] %s1294_s16 }
  0x37   :  { %v80_v8 = vld [vmem:[#allocation5 + $0x40] sm:$0xff]  ;;  %v81_v13 = vld [vmem:[#allocation5 + $0x48] sm:$0xff]  ;;  %v264_v17 = vld [vmem:[#allocation5 + $0xd0] sm:$0xff]  ;;  %v89_v2 = vshrl.u32 %v88_v60, 7  ;;  %s1471_s17 = scalar_lea.vmem %s1295_s16, 256  ;;  %p1476_p7 = scmp.lt.s32.totalorder %s1295_s16, %s1295_s16 }
  0x38   :  { %v1309_v11 = vcombine.high %v78_v7, %v80_v8  ;;  %164 = vmatprep.subr.bf16.mxu0 %v1313_v4  ;;  %v1311_v14 = vcombine.high %v79_v12, %v81_v13  ;;  %207 = vmatprep.subr.bf16.mxu1 %v1315_v9  ;;  %v1308_v18 = vcombine.low %v78_v7, %v80_v8  ;;  %v76_v19 = vld [vmem:[#allocation2 + $0x8] sm:$0xff]  ;;  %v258_v25 = vld [vmem:[#allocation5 + $0x10] sm:$0xff]  ;;  %v426_v36 = vld [vmem:[#allocation8 + $0x90] sm:$0xff]  ;;  %p1472_p6 = scmp.ne.s32.totalorder %s1295_s16, %s1471_s17  ;;  %p1477_p8 = scmp.lt.s32.totalorder %s1471_s17, %s1471_s17 }
  0x39   :  { %165 = vmatpush1.bf16.msra.mxu0 %v1312_v6  ;;  %v263_v20 = vld [vmem:[#allocation5 + $0x98] sm:$0xff]  ;;  %208 = vmatpush1.bf16.msra.mxu1 %v1314_v10  ;;  %v1310_v22 = vcombine.low %v79_v12, %v81_v13  ;;  %v1323_v23 = vcombine.high %v262_v16, %v264_v17  ;;  %v260_v26 = vld [vmem:[#allocation5 + $0x50] sm:$0xff]  ;;  %v1562_v27 = vpack.c.bf16 %v76_v19, %v75_v15  ;;  %v428_v37 = vld [vmem:[#allocation8 + $0xd0] sm:$0xff]  ;;  %v1598_v6 = vsub.s32 1, %v89_v2 }
  0x3a   :  { %v265_v21 = vld [vmem:[#allocation5 + $0xd8] sm:$0xff]  ;;  %166 = vmatprep.subr.bf16.mxu0 %v1309_v11  ;;  %209 = vmatprep.subr.bf16.mxu1 %v1311_v14  ;;  %v1322_v30 = vcombine.low %v262_v16, %v264_v17  ;;  %v1319_v32 = vcombine.high %v258_v25, %v260_v26  ;;  %v1318_v34 = vcombine.low %v258_v25, %v260_v26  ;;  %v427_v38 = vld [vmem:[#allocation8 + $0x98] sm:$0xff]  ;;  %v422_v44 = vld [vmem:[#allocation8 + $0x10] sm:$0xff]  ;;  %v1600_v9 = vsub.s32 0, %v89_v2  ;;  %p1478_p9 = por %p1477_p8, %p1476_p7 }
  0x3b   :  { %v1325_v24 = vcombine.high %v263_v20, %v265_v21  ;;  %v259_v28 = vld [vmem:[#allocation5 + $0x18] sm:$0xff]  ;;  %v1324_v31 = vcombine.low %v263_v20, %v265_v21  ;;  %v1333_v39 = vcombine.high %v426_v36, %v428_v37  ;;  %v429_v40 = vld [vmem:[#allocation8 + $0xd8] sm:$0xff]  ;;  %v1332_v41 = vcombine.low %v426_v36, %v428_v37  ;;  %v424_v45 = vld [vmem:[#allocation8 + $0x50] sm:$0xff] }
  0x3c   :  { %v261_v29 = vld [vmem:[#allocation5 + $0x58] sm:$0xff]  ;;  %v1334_v42 = vcombine.low %v427_v38, %v429_v40  ;;  %v1335_v43 = vcombine.high %v427_v38, %v429_v40  ;;  %v423_v46 = vld [vmem:[#allocation8 + $0x18] sm:$0xff]  ;;  %v1329_v47 = vcombine.high %v422_v44, %v424_v45  ;;  %v1328_v49 = vcombine.low %v422_v44, %v424_v45  ;;  %v1574_v52 = vld [vmem:[#allocation8 + $0x80] sm:$0xff]  ;;  %p1479_p10 = pnand %p1478_p9, %p1472_p6 }
  0x3d   :  { %167 = vmatpush1.bf16.msra.mxu0 %v1308_v18  ;;  %210 = vmatpush1.bf16.msra.mxu1 %v1310_v22  ;;  %v1321_v33 = vcombine.high %v259_v28, %v261_v29  ;;  %v1320_v35 = vcombine.low %v259_v28, %v261_v29  ;;  %v425_v48 = vld [vmem:[#allocation8 + $0x58] sm:$0xff]  ;;  %v1576_v53 = vld [vmem:[#allocation8 + $0xc0] sm:$0xff]  ;;  %v1578_v54 = vld [vmem:[#allocation8 + $0x88] sm:$0xff]  ;;  %v1602_v10 = vsub.s32 3, %v89_v2  ;;  %v1604_v12 = vsub.s32 2, %v89_v2 }
  0x3e   :  { %340 = vmatprep.subr.bf16.mxu0 %v1323_v23  ;;  %383 = vmatprep.subr.bf16.mxu1 %v1325_v24  ;;  %v1330_v50 = vcombine.low %v423_v46, %v425_v48  ;;  %v1331_v51 = vcombine.high %v423_v46, %v425_v48  ;;  %v1341_v55 = vcombine.high %v1574_v52, %v1576_v53  ;;  %v1582_v56 = vld [vmem:[#allocation8 + $0xc8] sm:$0xff]  ;;  %v266_v8 = vld [vmem:[#allocation7 + $0x4] sm:$0xf]  ;;  %v86_v18 = vld [vmem:[#allocation7] sm:$0xf] }
  0x3f   :  { %v1340_v57 = vcombine.low %v1574_v52, %v1576_v53  ;;  %v1342_v58 = vcombine.low %v1578_v54, %v1582_v56  ;;  %v1343_v59 = vcombine.high %v1578_v54, %v1582_v56  ;;  %v275_v14 = vrot.slane %v266_v8, %v1598_v6  ;;  %v246_v48 = vld [vmem:[#allocation8] sm:$0xff]  ;;  %v249_v60 = vld [vmem:[#allocation8 + $0x48] sm:$0xff] }
  0x40   :  { %1316 = vmatmul.mubr.msk.bf16.vlgmr.msra.gmra.mxu0 %vm148_vm0, %v1562_v27  ;;  %1317 = vmatmul.mubr.msk.bf16.vlgmr.msra.gmra.mxu1 %vm148_vm0, %v1562_v27  ;;  %v271_v15 = vrot.slane %v266_v8, %v1600_v9  ;;  %v283_v17 = vrot.slane %v266_v8, %v1602_v10  ;;  %v279_v19 = vrot.slane %v266_v8, %v1604_v12 }
  0x41   :  { %341 = vmatpush1.bf16.msra.mxu0 %v1322_v30  ;;  %384 = vmatpush1.bf16.msra.mxu1 %v1324_v31  ;;  %v95_v21 = vrot.slane %v86_v18, %v1598_v6  ;;  %v103_v23 = vrot.slane %v86_v18, %v1602_v10 }
  0x42   :  { %342 = vmatprep.subr.bf16.mxu0 %v1319_v32  ;;  %385 = vmatprep.subr.bf16.mxu1 %v1321_v33 }
  0x43   :  { %360 = vmatprep.mubr.bf16.mxu0 %v1507_v0  ;;  %403 = vmatprep.mubr.bf16.mxu1 %v1507_v0 }
  0x45   :  { %343 = vmatpush1.bf16.msra.mxu0 %v1318_v34  ;;  %386 = vmatpush1.bf16.msra.mxu1 %v1320_v35 }
  0x46   :  { %486 = vmatprep.subr.bf16.mxu0 %v1333_v39  ;;  %527 = vmatprep.subr.bf16.mxu1 %v1335_v43 }
  0x48   :  { %1326 = vmatmul.mubr.msk.bf16.vlgmr.msra.gmra.mxu0 %vm148_vm0, %v1562_v27  ;;  %1327 = vmatmul.mubr.msk.bf16.vlgmr.msra.gmra.mxu1 %vm148_vm0, %v1562_v27 }
  0x49   :  { %487 = vmatpush1.bf16.xpose.msra.mxu0 %v1332_v41  ;;  %528 = vmatpush1.bf16.xpose.msra.mxu1 %v1334_v42 }
  0x4a   :  { %488 = vmatprep.subr.bf16.mxu0 %v1329_v47  ;;  %529 = vmatprep.subr.bf16.mxu1 %v1331_v51 }
  0x51   :  { %489 = vmatpush1.bf16.xpose.msra.mxu0 %v1328_v49  ;;  %530 = vmatpush1.bf16.xpose.msra.mxu1 %v1330_v50  ;;  %v248_v49 = vld [vmem:[#allocation8 + $0x40] sm:$0xff] }
  0x52   :  { %608 = vmatprep.subr.bf16.mxu0 %v1341_v55  ;;  %649 = vmatprep.subr.bf16.mxu1 %v1343_v59  ;;  %v247_v59 = vld [vmem:[#allocation8 + $0x8] sm:$0xff] }
  0x53   :  { %v1338_v53 = vcombine.low %v247_v59, %v249_v60 }
 0x100   :  { %v1590_v61 = vpop.f32.mrf.mxu0  ;;  %v1592_v62 = vpop.f32.mrf.mxu1 }
 0x102   :  { %v188_v63 = vpop.f32.mrf.mxu0  ;;  %v231_v1 = vpop.f32.mrf.mxu1 }
 0x103   :  { %v189_v37 = vadd.f32 %v188_v63, %v95_v21  ;;  %v232_v40 = vadd.f32 %v231_v1, %v103_v23  ;;  %v1337_v1 = vcombine.high %v246_v48, %v248_v49 }
 0x104   :  { %v1594_v3 = vpop.f32.mrf.mxu0  ;;  %v1596_v4 = vpop.f32.mrf.mxu1 }
 0x105   :  { %v239_v2 = vmax.f32 %v189_v37, 0.0  ;;  %v848_v37 = vld [vmem:[#allocation8 + $0xe0] sm:$0xff] }
 0x106   :  { %v192_v5 = vpop.f32.mrf.mxu0  ;;  %v235_v7 = vpop.f32.mrf.mxu1 }
 0x107   :  { %v193_v28 = vadd.f32 %v192_v5, %v95_v21  ;;  %v236_v33 = vadd.f32 %v235_v7, %v103_v23  ;;  %v241_v7 = vmax.f32 %v232_v40, 0.0  ;;  %v99_v21 = vrot.slane %v86_v18, %v1604_v12  ;;  %v849_v40 = vld [vmem:[#allocation8 + $0xe8] sm:$0xff] }
 0x108   :  { %v362_v11 = vpop.f32.mrf.mxu0  ;;  %v405_v13 = vpop.f32.mrf.mxu1 }
 0x109   :  { %v363_v29 = vadd.f32 %v362_v11, %v271_v15  ;;  %v406_v34 = vadd.f32 %v405_v13, %v279_v19  ;;  %v243_v44 = vmax.f32 %v193_v28, 0.0  ;;  %v245_v50 = vmax.f32 %v236_v33, 0.0 }
 0x10a   :  { %v364_v16 = vpop.f32.mrf.mxu0  ;;  %v407_v20 = vpop.f32.mrf.mxu1  ;;  %v1339_v13 = vcombine.high %v247_v59, %v249_v60  ;;  %v234_v54 = vadd.f32 %v1596_v4, %v99_v21  ;;  %v230_v23 = vadd.f32 %v1592_v62, %v99_v21  ;;  %v1632_v59 = vld [vmem:[#allocation5 + $0xf0] sm:$0xff]  ;;  %v1634_v60 = vld [vmem:[#allocation5 + $0xb8] sm:$0xff] }
 0x10b   :  { %v365_v24 = vadd.f32 %v364_v16, %v275_v14  ;;  %v408_v30 = vadd.f32 %v407_v20, %v283_v17  ;;  %v414_v45 = vmax.f32 %v363_v29, 0.0  ;;  %v416_v51 = vmax.f32 %v406_v34, 0.0  ;;  %v684_v16 = vld [vmem:[#allocation5 + $0xe0] sm:$0xff]  ;;  %v685_v20 = vld [vmem:[#allocation5 + $0xe8] sm:$0xff] }
 0x10c   :  { %v366_v22 = vpop.f32.mrf.mxu0  ;;  %v409_v26 = vpop.f32.mrf.mxu1  ;;  %v255_v11 = vpack.c.bf16 %v243_v44, %v239_v2  ;;  %v679_v29 = vld [vmem:[#allocation5 + $0x28] sm:$0xff]  ;;  %v842_v44 = vld [vmem:[#allocation8 + $0x20] sm:$0xff] }
 0x10d   :  { %v367_v25 = vadd.f32 %v366_v22, %v271_v15  ;;  %v410_v31 = vadd.f32 %v409_v26, %v279_v19  ;;  %v415_v41 = vmax.f32 %v365_v24, 0.0  ;;  %v417_v46 = vmax.f32 %v408_v30, 0.0  ;;  %v682_v15 = vld [vmem:[#allocation5 + $0xa0] sm:$0xff]  ;;  %v683_v19 = vld [vmem:[#allocation5 + $0xa8] sm:$0xff] }
 0x10e   :  { %v368_v32 = vpop.f32.mrf.mxu0  ;;  %v411_v36 = vpop.f32.mrf.mxu1  ;;  %v1336_v22 = vcombine.low %v246_v48, %v248_v49  ;;  %v1351_v56 = vcombine.high %v683_v19, %v685_v20  ;;  %v678_v26 = vld [vmem:[#allocation5 + $0x20] sm:$0xff]  ;;  %v240_v30 = vmax.f32 %v230_v23, 0.0  ;;  %v1350_v4 = vcombine.low %v683_v19, %v685_v20  ;;  %v845_v48 = vld [vmem:[#allocation8 + $0x68] sm:$0xff] }
 0x10f   :  { %v369_v35 = vadd.f32 %v368_v32, %v275_v14  ;;  %v418_v38 = vmax.f32 %v367_v25, 0.0  ;;  %v412_v39 = vadd.f32 %v411_v36, %v283_v17  ;;  %v420_v42 = vmax.f32 %v410_v31, 0.0  ;;  %v846_v36 = vld [vmem:[#allocation8 + $0xa0] sm:$0xff] }
 0x110   :  { %v257_v14 = vpack.c.bf16 %v245_v50, %v241_v7  ;;  %v91_v17 = vrot.slane %v86_v18, %v1600_v9  ;;  %v244_v25 = vmax.f32 %v234_v54, 0.0  ;;  %v680_v18 = vld [vmem:[#allocation5 + $0x60] sm:$0xff]  ;;  %v1348_v31 = vcombine.low %v682_v15, %v684_v16 }
 0x111   :  { %v419_v43 = vmax.f32 %v369_v35, 0.0  ;;  %v421_v47 = vmax.f32 %v412_v39, 0.0  ;;  %v430_v5 = vpack.c.bf16 %v418_v38, %v414_v45  ;;  %v432_v8 = vpack.c.bf16 %v420_v42, %v416_v51  ;;  %v847_v38 = vld [vmem:[#allocation8 + $0xa8] sm:$0xff]  ;;  %v844_v45 = vld [vmem:[#allocation8 + $0x60] sm:$0xff] }
 0x112   :  { %v191_v52 = vadd.f32 %v1594_v3, %v91_v17  ;;  %v681_v3 = vld [vmem:[#allocation5 + $0x68] sm:$0xff]  ;;  %v1345_v33 = vcombine.high %v678_v26, %v680_v18  ;;  %v256_v34 = vpack.c.bf16 %v244_v25, %v240_v30  ;;  %v1344_v62 = vcombine.low %v678_v26, %v680_v18 }
 0x113   :  { %v431_v55 = vpack.c.bf16 %v419_v43, %v415_v41  ;;  %v433_v63 = vpack.c.bf16 %v421_v47, %v417_v46  ;;  %v1346_v35 = vcombine.low %v679_v29, %v681_v3  ;;  %v1359_v39 = vcombine.high %v846_v36, %v848_v37  ;;  %v843_v46 = vld [vmem:[#allocation8 + $0x28] sm:$0xff] }
 0x114   :  { %v242_v24 = vmax.f32 %v191_v52, 0.0  ;;  %v1358_v41 = vcombine.low %v846_v36, %v848_v37  ;;  %v1360_v42 = vcombine.low %v847_v38, %v849_v40  ;;  %v1361_v43 = vcombine.high %v847_v38, %v849_v40 }
 0x115   :  { %506 = vmatprep.mubr.bf16.mxu0 %v431_v55  ;;  %547 = vmatprep.mubr.bf16.mxu1 %v433_v63  ;;  %v1355_v47 = vcombine.high %v842_v44, %v844_v45  ;;  %v1354_v49 = vcombine.low %v842_v44, %v844_v45  ;;  %v1356_v50 = vcombine.low %v843_v46, %v845_v48  ;;  %v1630_v55 = vld [vmem:[#allocation5 + $0xb0] sm:$0xff] }
 0x116   :  { %507 = vmatmul.mubr.bf16.vlgmr.msra.gmra.mxu0 %v430_v5  ;;  %548 = vmatmul.mubr.bf16.vlgmr.msra.gmra.mxu1 %v432_v8  ;;  %v1357_v51 = vcombine.high %v843_v46, %v845_v48  ;;  %v1367_v2 = vcombine.high %v1630_v55, %v1632_v59  ;;  %v1638_v5 = vld [vmem:[#allocation5 + $0xf8] sm:$0xff]  ;;  %v1366_v63 = vcombine.low %v1630_v55, %v1632_v59  ;;  %v1146_v55 = vld [vmem:[#allocation8 + $0xb0] sm:$0xff] }
 0x117   :  { %609 = vmatpush1.bf16.xpose.msra.mxu0 %v1340_v57  ;;  %650 = vmatpush1.bf16.xpose.msra.mxu1 %v1342_v58  ;;  %v1349_v57 = vcombine.high %v682_v15, %v684_v16  ;;  %v187_v58 = vadd.f32 %v1590_v61, %v91_v17  ;;  %v1347_v61 = vcombine.high %v679_v29, %v681_v3  ;;  %v1148_v59 = vld [vmem:[#allocation8 + $0xf0] sm:$0xff] }
 0x118   :  { %628 = vmatprep.mubr.bf16.mxu0 %v255_v11  ;;  %669 = vmatprep.mubr.bf16.mxu1 %v257_v14  ;;  %v1368_v7 = vcombine.low %v1634_v60, %v1638_v5  ;;  %v1369_v8 = vcombine.high %v1634_v60, %v1638_v5  ;;  %v1377_v60 = vcombine.high %v1146_v55, %v1148_v59  ;;  %v1149_v5 = vld [vmem:[#allocation8 + $0xf8] sm:$0xff] }
 0x119   :  { %610 = vmatprep.subr.bf16.mxu0 %v1337_v1  ;;  %651 = vmatprep.subr.bf16.mxu1 %v1339_v13  ;;  %v238_v28 = vmax.f32 %v187_v58, 0.0 }
 0x11b   :  { %v254_v32 = vpack.c.bf16 %v242_v24, %v238_v28  ;;  %v686_v28 = vld [vmem:[#allocation7 + $0x8] sm:$0xf] }
 0x11c   :  { %v695_v30 = vrot.slane %v686_v28, %v1598_v6 }
 0x11f   :  { %611 = vmatpush1.bf16.xpose.msra.mxu0 %v1336_v22  ;;  %652 = vmatpush1.bf16.xpose.msra.mxu1 %v1338_v53 }
 0x120   :  { %760 = vmatprep.subr.bf16.mxu0 %v1349_v57  ;;  %803 = vmatprep.subr.bf16.mxu1 %v1351_v56 }
 0x126   :  { %629 = vmatmul.mubr.bf16.vlgmr.msra.gmra.mxu0 %v254_v32  ;;  %670 = vmatmul.mubr.bf16.vlgmr.msra.gmra.mxu1 %v256_v34 }
 0x127   :  { %761 = vmatpush1.bf16.msra.mxu0 %v1348_v31  ;;  %804 = vmatpush1.bf16.msra.mxu1 %v1350_v4  ;;  %v691_v31 = vrot.slane %v686_v28, %v1600_v9  ;;  %v703_v4 = vrot.slane %v686_v28, %v1602_v10 }
 0x128   :  { %762 = vmatprep.subr.bf16.mxu0 %v1345_v33  ;;  %805 = vmatprep.subr.bf16.mxu1 %v1347_v61  ;;  %v699_v33 = vrot.slane %v686_v28, %v1604_v12 }
 0x129   :  { %780 = vmatprep.mubr.bf16.mxu0 %v1507_v0  ;;  %823 = vmatprep.mubr.bf16.mxu1 %v1507_v0 }
 0x12b   :  { %763 = vmatpush1.bf16.msra.mxu0 %v1344_v62  ;;  %806 = vmatpush1.bf16.msra.mxu1 %v1346_v35 }
 0x12c   :  { %906 = vmatprep.subr.bf16.mxu0 %v1359_v39  ;;  %947 = vmatprep.subr.bf16.mxu1 %v1361_v43 }
 0x12e   :  { %1352 = vmatmul.mubr.msk.bf16.vlgmr.msra.gmra.mxu0 %vm148_vm0, %v1562_v27  ;;  %1353 = vmatmul.mubr.msk.bf16.vlgmr.msra.gmra.mxu1 %vm148_vm0, %v1562_v27 }
 0x12f   :  { %907 = vmatpush1.bf16.xpose.msra.mxu0 %v1358_v41  ;;  %948 = vmatpush1.bf16.xpose.msra.mxu1 %v1360_v42 }
 0x130   :  { %908 = vmatprep.subr.bf16.mxu0 %v1355_v47  ;;  %949 = vmatprep.subr.bf16.mxu1 %v1357_v51 }
 0x137   :  { %909 = vmatpush1.bf16.xpose.msra.mxu0 %v1354_v49  ;;  %950 = vmatpush1.bf16.xpose.msra.mxu1 %v1356_v50  ;;  %v978_v49 = vld [vmem:[#allocation5 + $0x30] sm:$0xff] }
 0x138   :  { %1060 = vmatprep.subr.bf16.mxu0 %v1367_v2  ;;  %1103 = vmatprep.subr.bf16.mxu1 %v1369_v8  ;;  %v980_v50 = vld [vmem:[#allocation5 + $0x70] sm:$0xff] }
 0x1d6   :  { %v508_v1 = vpop.f32.mrf.mxu0  ;;  %v549_v11 = vpop.f32.mrf.mxu1 }
 0x1d7   :  { %v550_v13 = vadd.f32 %v549_v11, %v508_v1  ;;  %v979_v1 = vld [vmem:[#allocation5 + $0x38] sm:$0xff] }
 0x1d8   :  { %v510_v14 = vpop.f32.mrf.mxu0  ;;  %v551_v15 = vpop.f32.mrf.mxu1  ;;  %v981_v11 = vld [vmem:[#allocation5 + $0x78] sm:$0xff] }
 0x1da   :  { %v511_v16 = vpop.f32.mrf.mxu0  ;;  %v552_v17 = vpop.f32.mrf.mxu1 }
 0x1db   :  { %v553_v19 = vadd.f32 %v552_v17, %v511_v16  ;;  %v1363_v17 = vcombine.high %v978_v49, %v980_v50 }
 0x1dc   :  { %v513_v20 = vpop.f32.mrf.mxu0  ;;  %v554_v21 = vpop.f32.mrf.mxu1 }
 0x1dd   :  { %v1365_v20 = vcombine.high %v979_v1, %v981_v11  ;;  %v1362_v21 = vcombine.low %v978_v49, %v980_v50 }
 0x1e6   :  { %v630_v22 = vpop.f32.mrf.mxu0  ;;  %v671_v53 = vpop.f32.mrf.mxu1 }
 0x1e7   :  { %v631_v52 = vadd.f32 %v630_v22, %v550_v13  ;;  %v1364_v22 = vcombine.low %v979_v1, %v981_v11 }
 0x1e8   :  { %v632_v57 = vpop.f32.mrf.mxu0  ;;  %v673_v56 = vpop.f32.mrf.mxu1 }
 0x1e9   :  { %v1646_v54 = vadd.f32 %v671_v53, %v631_v52  ;;  %v1144_v57 = vld [vmem:[#allocation8 + $0x70] sm:$0xff]  ;;  %v1143_v56 = vld [vmem:[#allocation8 + $0x38] sm:$0xff] }
 0x1ea   :  { %v633_v58 = vpop.f32.mrf.mxu0  ;;  %v674_v24 = vpop.f32.mrf.mxu1 }
 0x1eb   :  { %v634_v23 = vadd.f32 %v633_v58, %v553_v19 }
 0x1ec   :  { %v635_v25 = vpop.f32.mrf.mxu0  ;;  %v676_v18 = vpop.f32.mrf.mxu1 }
 0x1ed   :  { %v1648_v26 = vadd.f32 %v674_v24, %v634_v23  ;;  %v1145_v23 = vld [vmem:[#allocation8 + $0x78] sm:$0xff] }
 0x1ee   :  { %v782_v29 = vpop.f32.mrf.mxu0  ;;  %v825_v3 = vpop.f32.mrf.mxu1  ;;  %v1374_v25 = vcombine.low %v1143_v56, %v1145_v23 }
 0x1ef   :  { %v783_v37 = vadd.f32 %v782_v29, %v691_v31  ;;  %v826_v41 = vadd.f32 %v825_v3, %v699_v33 }
 0x1f0   :  { %v784_v32 = vpop.f32.mrf.mxu0  ;;  %v827_v34 = vpop.f32.mrf.mxu1 }
 0x1f1   :  { %v785_v62 = vadd.f32 %v784_v32, %v695_v30  ;;  %v828_v38 = vadd.f32 %v827_v34, %v703_v4  ;;  %v834_v51 = vmax.f32 %v783_v37, 0.0  ;;  %v836_v13 = vmax.f32 %v826_v41, 0.0 }
 0x1f2   :  { %v786_v61 = vpop.f32.mrf.mxu0  ;;  %v829_v36 = vpop.f32.mrf.mxu1 }
 0x1f3   :  { %v787_v35 = vadd.f32 %v786_v61, %v691_v31  ;;  %v830_v39 = vadd.f32 %v829_v36, %v699_v33  ;;  %v835_v46 = vmax.f32 %v785_v62, 0.0  ;;  %v837_v2 = vmax.f32 %v828_v38, 0.0  ;;  %v986_v62 = vld [vmem:[#allocation7 + $0xc] sm:$0xf] }
 0x1f4   :  { %v788_v40 = vpop.f32.mrf.mxu0  ;;  %v831_v43 = vpop.f32.mrf.mxu1  ;;  %v995_v38 = vrot.slane %v986_v62, %v1598_v6  ;;  %v1003_v41 = vrot.slane %v986_v62, %v1602_v10 }
 0x1f5   :  { %v789_v42 = vadd.f32 %v788_v40, %v695_v30  ;;  %v838_v44 = vmax.f32 %v787_v35, 0.0  ;;  %v832_v45 = vadd.f32 %v831_v43, %v703_v4  ;;  %v840_v47 = vmax.f32 %v830_v39, 0.0 }
 0x1f6   :  { %v991_v39 = vrot.slane %v986_v62, %v1600_v9 }
 0x1f7   :  { %v839_v48 = vmax.f32 %v789_v42, 0.0  ;;  %v841_v8 = vmax.f32 %v832_v45, 0.0  ;;  %v850_v15 = vpack.c.bf16 %v838_v44, %v834_v51  ;;  %v852_v19 = vpack.c.bf16 %v840_v47, %v836_v13 }
 0x1f8   :  { %v999_v42 = vrot.slane %v986_v62, %v1604_v12 }
 0x1f9   :  { %v851_v14 = vpack.c.bf16 %v839_v48, %v835_v46  ;;  %v853_v16 = vpack.c.bf16 %v841_v8, %v837_v2 }
 0x1fb   :  { %926 = vmatprep.mubr.bf16.mxu0 %v851_v14  ;;  %967 = vmatprep.mubr.bf16.mxu1 %v853_v16 }
 0x1fc   :  { %927 = vmatmul.mubr.bf16.vlgmr.msra.gmra.mxu0 %v850_v15  ;;  %968 = vmatmul.mubr.bf16.vlgmr.msra.gmra.mxu1 %v852_v19 }
 0x1fd   :  { %1061 = vmatpush1.bf16.msra.mxu0 %v1366_v63  ;;  %1104 = vmatpush1.bf16.msra.mxu1 %v1368_v7  ;;  %v1147_v63 = vld [vmem:[#allocation8 + $0xb8] sm:$0xff]  ;;  %v1376_v7 = vcombine.low %v1146_v55, %v1148_v59  ;;  %v1380_v59 = vld [vmem:[%s1687_s4] ss:$0 sm:$0xff] }
 0x1fe   :  { %1062 = vmatprep.subr.bf16.mxu0 %v1363_v17  ;;  %1105 = vmatprep.subr.bf16.mxu1 %v1365_v20  ;;  %v1378_v52 = vcombine.low %v1147_v63, %v1149_v5  ;;  %v1379_v53 = vcombine.high %v1147_v63, %v1149_v5 }
 0x1ff   :  { %1080 = vmatprep.mubr.bf16.mxu0 %v1507_v0  ;;  %1123 = vmatprep.mubr.bf16.mxu1 %v1507_v0  ;;  %v1142_v0 = vld [vmem:[#allocation8 + $0x30] sm:$0xff] }
 0x200   :  { %v1373_v58 = vcombine.high %v1142_v0, %v1144_v57  ;;  %v1372_v24 = vcombine.low %v1142_v0, %v1144_v57 }
 0x201   :  { %1063 = vmatpush1.bf16.msra.mxu0 %v1362_v21  ;;  %1106 = vmatpush1.bf16.msra.mxu1 %v1364_v22 }
 0x202   :  { %1206 = vmatprep.subr.bf16.mxu0 %v1377_v60  ;;  %1247 = vmatprep.subr.bf16.mxu1 %v1379_v53 }
 0x204   :  { %1370 = vmatmul.mubr.msk.bf16.vlgmr.msra.gmra.mxu0 %vm148_vm0, %v1562_v27  ;;  %1371 = vmatmul.mubr.msk.bf16.vlgmr.msra.gmra.mxu1 %vm148_vm0, %v1562_v27  ;;  %v1375_v27 = vcombine.high %v1143_v56, %v1145_v23 }
 0x205   :  { %1207 = vmatpush1.bf16.xpose.msra.mxu0 %v1376_v7  ;;  %1248 = vmatpush1.bf16.xpose.msra.mxu1 %v1378_v52 }
 0x206   :  { %1208 = vmatprep.subr.bf16.mxu0 %v1373_v58  ;;  %1249 = vmatprep.subr.bf16.mxu1 %v1375_v27 }
 0x20d   :  { %1209 = vmatpush1.bf16.xpose.msra.mxu0 %v1372_v24  ;;  %1250 = vmatpush1.bf16.xpose.msra.mxu1 %v1374_v25 }
 0x2bc   :  { %v928_v18 = vpop.f32.mrf.mxu0  ;;  %v969_v28 = vpop.f32.mrf.mxu1 }
 0x2bd   :  { %v970_v29 = vadd.f32 %v969_v28, %v928_v18 }
 0x2be   :  { %v930_v3 = vpop.f32.mrf.mxu0  ;;  %v971_v30 = vpop.f32.mrf.mxu1 }
 0x2bf   :  { %v976_v31 = vadd.f32 %v970_v29, %v1646_v54 }
 0x2c0   :  { %v931_v32 = vpop.f32.mrf.mxu0  ;;  %v972_v4 = vpop.f32.mrf.mxu1 }
 0x2c1   :  { %v973_v33 = vadd.f32 %v972_v4, %v931_v32 }
 0x2c2   :  { %v933_v34 = vpop.f32.mrf.mxu0  ;;  %v974_v61 = vpop.f32.mrf.mxu1 }
 0x2c3   :  { %v977_v35 = vadd.f32 %v973_v33, %v1648_v26 }
 0x2c4   :  { %v1082_v36 = vpop.f32.mrf.mxu0  ;;  %v1125_v37 = vpop.f32.mrf.mxu1 }
 0x2c5   :  { %v1083_v47 = vadd.f32 %v1082_v36, %v991_v39  ;;  %v1126_v50 = vadd.f32 %v1125_v37, %v999_v42 }
 0x2c6   :  { %v1084_v40 = vpop.f32.mrf.mxu0  ;;  %v1127_v54 = vpop.f32.mrf.mxu1 }
 0x2c7   :  { %v1085_v44 = vadd.f32 %v1084_v40, %v995_v38  ;;  %v1128_v48 = vadd.f32 %v1127_v54, %v1003_v41  ;;  %v1134_v10 = vmax.f32 %v1083_v47, 0.0  ;;  %v1136_v14 = vmax.f32 %v1126_v50, 0.0 }
 0x2c8   :  { %v1086_v43 = vpop.f32.mrf.mxu0  ;;  %v1129_v46 = vpop.f32.mrf.mxu1 }
 0x2c9   :  { %v1087_v45 = vadd.f32 %v1086_v43, %v991_v39  ;;  %v1130_v49 = vadd.f32 %v1129_v46, %v999_v42  ;;  %v1135_v9 = vmax.f32 %v1085_v44, 0.0  ;;  %v1137_v13 = vmax.f32 %v1128_v48, 0.0 }
 0x2ca   :  { %v1088_v26 = vpop.f32.mrf.mxu0  ;;  %v1131_v2 = vpop.f32.mrf.mxu1 }
 0x2cb   :  { %v1089_v51 = vadd.f32 %v1088_v26, %v995_v38  ;;  %v1138_v6 = vmax.f32 %v1087_v45, 0.0  ;;  %v1132_v8 = vadd.f32 %v1131_v2, %v1003_v41  ;;  %v1140_v1 = vmax.f32 %v1130_v49, 0.0 }
 0x2cd   :  { %v1139_v11 = vmax.f32 %v1089_v51, 0.0  ;;  %v1141_v12 = vmax.f32 %v1132_v8, 0.0  ;;  %v1150_v16 = vpack.c.bf16 %v1138_v6, %v1134_v10  ;;  %v1152_v19 = vpack.c.bf16 %v1140_v1, %v1136_v14 }
 0x2cf   :  { %v1151_v15 = vpack.c.bf16 %v1139_v11, %v1135_v9  ;;  %v1153_v17 = vpack.c.bf16 %v1141_v12, %v1137_v13 }
 0x2d1   :  { %1226 = vmatprep.mubr.bf16.mxu0 %v1151_v15  ;;  %1267 = vmatprep.mubr.bf16.mxu1 %v1153_v17 }
 0x2d2   :  { %1227 = vmatmul.mubr.bf16.vlgmr.msra.gmra.mxu0 %v1150_v16  ;;  %1268 = vmatmul.mubr.bf16.vlgmr.msra.gmra.mxu1 %v1152_v19 }
 0x392   :  { %v1228_v20 = vpop.f32.mrf.mxu0  ;;  %v1269_v21 = vpop.f32.mrf.mxu1 }
 0x393   :  { %v1270_v22 = vadd.f32 %v1269_v21, %v1228_v20 }
 0x394   :  { %v1230_v55 = vpop.f32.mrf.mxu0  ;;  %v1271_v63 = vpop.f32.mrf.mxu1 }
 0x395   :  { %v1276_v60 = vadd.f32 %v1270_v22, %v976_v31 }
 0x396   :  { %v1231_v5 = vpop.f32.mrf.mxu0  ;;  %v1272_v7 = vpop.f32.mrf.mxu1 }
 0x397   :  { %v1285_v52 = vadd.f32 %v1380_v59, %v1276_v60  ;;  %v1273_v53 = vadd.f32 %v1272_v7, %v1231_v5 }
 0x398   :  { %v1233_v0 = vpop.f32.mrf.mxu0  ;;  %v1274_v57 = vpop.f32.mrf.mxu1 }
 0x399   :  { %1287 = vst.msk [vmem:[#allocation10] sm:$0xff] %vm148_vm0, %v1285_v52  ;;  %v1277_v56 = vadd.f32 %v1273_v53, %v977_v35 }
 0x39b   :  { %v1286_v58 = vadd.f32 %v1380_v59, %v1277_v56 }
 0x39d   :  { %1288 = vst.msk [vmem:[#allocation10 + $0x8] sm:$0xff] %vm148_vm0, %v1286_v58 }
 0x39e   :  { %1482 = shalt.err (!%p1479_p10)
}
 0x39f   :  { %1300 = dma.vmem_to_hbm [thread:$0]  %s1295_s16, 256, %s1688_s5, [#allocation4], %s1503_s28, %s1503_s28, %s1504_s29  }
 0x3a0   :  { %1497 = dma.done.wait [#allocation4], 256  }
 0x3a1   :  { %1498 = vsyncadd [#allocation4], 4294967040 }
 0x3a2   :  { %1304 = vsyncpa [#allocation3], 1 }
 0x3a3   :  { %1305 = vsyncpa [#allocation6], 1 }
 0x3a4   :  { %1306 = vsyncpa [#allocation9], 1 }
 0x3a5   :  { %1307 = vsyncpa [#allocation4], 1 }

</bundles_post_ra>
